<compile_context>
chip_gen: v5e
topology: v5e:2x2
jax: 0.10.0
libtpu: 0.0.40
codegen_flags: <defaults>
</compile_context>

<pallas_src>
import jax
import jax.numpy as jnp
import numpy as np
from jax.experimental import pallas as pl
from jax.experimental.pallas import tpu as pltpu


def cnn_kernel(x_ref, m_ref, c_ref, o_ref):
    # x_ref: (Bb, T*N)   batch rows on sublanes, flattened (t, n) on lanes
    # m_ref: (T*N, H*N)  fused affine weight (resident: same block every step)
    # c_ref: (1, H*N)    fused affine bias
    # o_ref: (Bb, H*N)
    x = x_ref[...].astype(jnp.float32)        # upcast right after load (bf16-I/O safe on v5e)
    out = jnp.dot(x, m_ref[...], preferred_element_type=jnp.float32) + c_ref[...]
    o_ref[...] = out.astype(o_ref.dtype)


def _build_affine_map(conv_w, conv_b, lin_w, lin_b, T, N):
    """Fold conv_1 + linear_1 + the seq_last subtract/add into one affine map.

    Weight-only preprocessing (done once, independent of the data):
      out[b, h, n] = sum_{t, n'} M4[t, n', h, n] * x[b, t, n'] + b_eff[h]
    """
    H = lin_w.shape[0]
    w_eff = jnp.einsum('hf,ftk->kht', lin_w, conv_w)                 # (3, H, T)
    b_eff = lin_w @ conv_b + lin_b                                   # (H,)
    # S[k, n', n] = 1 iff tap k of the 'same'-padded k=3 conv at output position
    # n reads series index n' (= n + k - 1; zero outside [0, N)).
    S = jnp.stack([jnp.eye(N, k=1), jnp.eye(N), jnp.eye(N, k=-1)])   # (3, N, N)
    M4 = jnp.einsum('kht,kmn->tmhn', w_eff, S)                       # (T, N, H, N): [t, n', h, n]
    # xc = x - x[:, -1, :]  and  out += x[:, -1, :]  are both linear in
    # x[:, T-1, :]; fold them into the t = T-1 rows.
    last_fix = -M4.sum(axis=0) + jnp.eye(N)[:, None, :]              # (N, H, N)
    M4 = M4.at[T - 1].add(last_fix)
    M = M4.reshape(T * N, H * N).astype(jnp.float32)
    c = jnp.broadcast_to(b_eff[:, None], (H, N)).reshape(1, H * N).astype(jnp.float32)
    return M, c


def _choose_batch_block(batch, in_row_bytes, itemsize,
                        budget_bytes=8 << 20, min_steps=4):
    """Rows per grid step: ~8 MiB of input per step (mem-bound roofline), at
    least `min_steps` grid steps when the batch allows (v7x megacore sharding),
    and a sublane-tile-aligned row count for the I/O dtype."""
    sub = max(8, 32 // itemsize)              # 8 (f32) / 16 (bf16) / 32 (int8)
    if batch <= sub:
        return batch                          # full-extent block is always legal
    bb = max(sub, budget_bytes // in_row_bytes)
    bb = min(bb, max(sub, -(-batch // min_steps)))
    bb = min(bb, batch)
    return max(sub, (bb // sub) * sub)


def cnn_forward(x, conv_w, conv_b, lin_w, lin_b):
    """x: (B, T, N); conv_w: (F, T, 3); conv_b: (F,); lin_w: (H, F); lin_b: (H,)."""
    B, T, N = x.shape
    H = lin_w.shape[0]
    dtype = x.dtype
    itemsize = jnp.dtype(dtype).itemsize

    M, c = _build_affine_map(conv_w, conv_b, lin_w, lin_b, T, N)

    # Free (no-copy) reshape: no wrapper transposes, no extra HBM passes.
    xf = x.reshape(B, T * N)

    Bb = _choose_batch_block(B, T * N * itemsize, itemsize)
    grid = (-(-B // Bb),)

    in_tile = Bb * T * N * itemsize
    out_tile = Bb * H * N * itemsize
    f32_tmp = Bb * (T * N + H * N) * 4                # in-kernel upcast + dot result
    vmem_bytes = 2 * (in_tile + out_tile) + f32_tmp + 4 * (M.size + c.size) + (2 << 20)
    vmem_bytes = max(int(vmem_bytes), 32 << 20)        # never below the default scoped limit

    out2 = pl.pallas_call(
        cnn_kernel,
        out_shape=jax.ShapeDtypeStruct((B, H * N), dtype),
        grid_spec=pltpu.PrefetchScalarGridSpec(
            num_scalar_prefetch=0,
            grid=grid,
            in_specs=[
                pl.BlockSpec((Bb, T * N), lambda i: (i, 0)),
                pl.BlockSpec((T * N, H * N), lambda i: (0, 0)),   # resident; DMA'd once
                pl.BlockSpec((1, H * N), lambda i: (0, 0)),       # resident; DMA'd once
            ],
            out_specs=pl.BlockSpec((Bb, H * N), lambda i: (i, 0)),
        ),
        compiler_params=pltpu.CompilerParams(
            dimension_semantics=("parallel",),        # independent batch chunks -> both v7x TCs
            vmem_limit_bytes=vmem_bytes,
        ),
    )(xf, M, c)

    # Free (no-copy) reshape back to (B, H, N).
    return out2.reshape(B, H, N)


def cnn_forward_ref(x, conv_w, conv_b, lin_w, lin_b):
    """Pure-JAX reference of the PyTorch forward."""
    B, T, N = x.shape
    last = x[:, -1:, :]
    xc = x - last
    xc_pad = jnp.pad(xc, ((0, 0), (0, 0), (1, 1)))
    conv = (jnp.einsum('ft,btn->bfn', conv_w[:, :, 0], xc_pad[:, :, 0:N])
            + jnp.einsum('ft,btn->bfn', conv_w[:, :, 1], xc_pad[:, :, 1:N + 1])
            + jnp.einsum('ft,btn->bfn', conv_w[:, :, 2], xc_pad[:, :, 2:N + 2])
            + conv_b[None, :, None])
    lin = jnp.einsum('hf,bfn->bhn', lin_w, conv) + lin_b[None, :, None]
    return lin + last


if __name__ == "__main__":
    def make_params(T, N, H, F_, seed):
        key = jax.random.PRNGKey(seed)
        k2, k3, k4, k5 = jax.random.split(key, 4)
        conv_w = 0.1 * jax.random.normal(k2, (F_, T, 3), dtype=jnp.float32)  # Conv1d(T->F, k=3)
        conv_b = 0.1 * jax.random.normal(k3, (F_,), dtype=jnp.float32)
        lin_w = 0.1 * jax.random.normal(k4, (H, F_), dtype=jnp.float32)      # Linear(F->H)
        lin_b = 0.1 * jax.random.normal(k5, (H,), dtype=jnp.float32)
        return conv_w, conv_b, lin_w, lin_b

    def run_case(B, T, N, H, F_, seed, io_dtype=jnp.float32, rtol=1e-5, atol=1e-5):
        conv_w, conv_b, lin_w, lin_b = make_params(T, N, H, F_, seed)
        x = jax.random.normal(jax.random.PRNGKey(seed + 100), (B, T, N),
                              dtype=jnp.float32).astype(io_dtype)
        out = jax.block_until_ready(cnn_forward(x, conv_w, conv_b, lin_w, lin_b))
        ref = cnn_forward_ref(x.astype(jnp.float32), conv_w, conv_b, lin_w, lin_b)
        np.testing.assert_allclose(np.asarray(out, dtype=np.float32),
                                   np.asarray(ref), rtol=rtol, atol=atol)

    # Shapes consistent with the module:
    #   batch=2, past_history(T)=16, num_series(N)=8, forecast_horizon(H)=4, filters(F)=8.
    run_case(B=2, T=16, N=8, H=4, F_=8, seed=0)
    # Larger batch: multiple 'parallel' grid steps (Bb=8 -> 4 steps).
    run_case(B=32, T=16, N=8, H=4, F_=8, seed=1)
    # bf16 I/O path (review item for v5e/v6e): upcast-after-load, f32 compute/accumulate.
    run_case(B=32, T=16, N=8, H=4, F_=8, seed=2, io_dtype=jnp.bfloat16,
             rtol=2e-2, atol=2e-2)

    print("KERNEL_OK")
</pallas_src>

<mosaic_0001>
module attributes {stable_mosaic.version = 11 : i64} {
  func.func @cnn_kernel(%arg0: i32, %arg1: memref<2x128xf32, #tpu.memory_space<vmem>>, %arg2: memref<128x32xf32, #tpu.memory_space<vmem>>, %arg3: memref<1x32xf32, #tpu.memory_space<vmem>>, %arg4: memref<2x32xf32, #tpu.memory_space<vmem>>) attributes {dimension_semantics = [#tpu.dimension_semantics<parallel>], iteration_bounds = array<i64: 1>, scalar_prefetch = 0 : i64, scratch_operands = 0 : i64, tpu.core_type = #tpu.core_type<tc>, window_params = [{transform_indices = @transform_0, window_bounds = array<i64: 2, 128>}, {pipeline_mode = #tpu.pipeline_mode<synchronous>, transform_indices = @transform_1, window_bounds = array<i64: 128, 32>}, {pipeline_mode = #tpu.pipeline_mode<synchronous>, transform_indices = @transform_2, window_bounds = array<i64: 1, 32>}, {transform_indices = @transform_3, window_bounds = array<i64: 2, 32>}]} {
    %c0 = arith.constant 0 : index
    %c0_0 = arith.constant 0 : index
    %0 = vector.load %arg1[%c0, %c0_0] : memref<2x128xf32, #tpu.memory_space<vmem>>, vector<2x128xf32>
    %c0_1 = arith.constant 0 : index
    %c0_2 = arith.constant 0 : index
    %1 = vector.load %arg2[%c0_1, %c0_2] : memref<128x32xf32, #tpu.memory_space<vmem>>, vector<128x32xf32>
    %cst = arith.constant dense<0.000000e+00> : vector<2x32xf32>
    %2 = tpu.matmul %0, %1, %cst {dimension_numbers = #tpu.dot_dimension_numbers<[1], [0], [0], [1], [0, 0, 1, 1], [], []>} : vector<2x128xf32>, vector<128x32xf32>, vector<2x32xf32> -> vector<2x32xf32>
    %c0_3 = arith.constant 0 : index
    %c0_4 = arith.constant 0 : index
    %3 = vector.load %arg3[%c0_3, %c0_4] : memref<1x32xf32, #tpu.memory_space<vmem>>, vector<1x32xf32>
    %4 = vector.broadcast %3 : vector<1x32xf32> to vector<2x32xf32>
    %5 = arith.addf %2, %4 : vector<2x32xf32>
    %c0_5 = arith.constant 0 : index
    %c0_6 = arith.constant 0 : index
    %6 = vector.load %arg4[%c0_5, %c0_6] : memref<2x32xf32, #tpu.memory_space<vmem>>, vector<2x32xf32>
    tpu.vector_store %arg4[%c0_5, %c0_6], %5 {strides = array<i32>} : memref<2x32xf32, #tpu.memory_space<vmem>>, vector<2x32xf32>,
    return
  }
  func.func @transform_0(%arg0: i32) -> (i32, i32) {
    %c0_i32 = arith.constant 0 : i32
    %c0_i32_0 = arith.constant 0 : i32
    return %arg0, %c0_i32 : i32, i32
  }
  func.func @transform_1(%arg0: i32) -> (i32, i32) {
    %c0_i32 = arith.constant 0 : i32
    %c0_i32_0 = arith.constant 0 : i32
    %c0_i32_1 = arith.constant 0 : i32
    return %c0_i32, %c0_i32_0 : i32, i32
  }
  func.func @transform_2(%arg0: i32) -> (i32, i32) {
    %c0_i32 = arith.constant 0 : i32
    %c0_i32_0 = arith.constant 0 : i32
    %c0_i32_1 = arith.constant 0 : i32
    return %c0_i32, %c0_i32_0 : i32, i32
  }
  func.func @transform_3(%arg0: i32) -> (i32, i32) {
    %c0_i32 = arith.constant 0 : i32
    %c0_i32_0 = arith.constant 0 : i32
    return %arg0, %c0_i32 : i32, i32
  }
}

</mosaic_0001>

<bundles_post_ra>
// kernel: tpu_custom_call.1
= control target key start
LH: loop header
LB: loop body
LE: loop exit
PB: predicated region body
PF: predicated region fallthrough
CT: control target
= control target key end

     0   :  { %s180_s0 = inlined_call_operand.vmem [shape: f32[2,128], index: 0, kind: input, shape index: {}]   ;;  %s181_s1 = inlined_call_operand.vmem [shape: f32[128,32], index: 1, kind: input, shape index: {}]   ;;  %s182_s2 = inlined_call_operand.vmem [shape: f32[1,32], index: 2, kind: input, shape index: {}]   ;;  %s183_s3 = inlined_call_operand.hbm [shape: f32[2,32], index: 3, kind: output, shape index: {}]  }
   0x1   :  { %v31_v0 = vld [vmem:[%s181_s1 + $0x78] sm:$0xff]  ;;  %v30_v1 = vld [vmem:[%s181_s1 + $0x70] sm:$0xff]  ;;  %v29_v2 = vld [vmem:[%s181_s1 + $0x68] sm:$0xff] }
   0x2   :  { %36 = vmatpush.msra.mxu0 %v31_v0  ;;  %v28_v3 = vld [vmem:[%s181_s1 + $0x60] sm:$0xff]  ;;  %v27_v4 = vld [vmem:[%s181_s1 + $0x58] sm:$0xff] }
   0x4   :  { %37 = vmatpush.msra.mxu0 %v30_v1 }
   0x6   :  { %38 = vmatpush.msra.mxu0 %v29_v2 }
   0x7   :  { %8 = vsyncpa [#allocation3], 0  ;;  %v26_v5 = vld [vmem:[%s181_s1 + $0x50] sm:$0xff]  ;;  %v25_v6 = vld [vmem:[%s181_s1 + $0x48] sm:$0xff]  ;;  %s102_s21 = smov [#allocation2]   ;;  %s65_s25 = sshll.u32 %s183_s3, 4  ;;  %s66_s25 = int_to_ptr.hbm [resolvable:$true] %s65_s25 }
   0x8   :  { %39 = vmatpush.msra.mxu0 %v28_v3  ;;  %v24_v7 = vld [vmem:[%s181_s1 + $0x40] sm:$0xff]  ;;  %v23_v8 = vld [vmem:[%s181_s1 + $0x38] sm:$0xff]  ;;  %v22_v9 = vld [vmem:[%s181_s1 + $0x30] sm:$0xff]  ;;  %s63_s22 = sshll.u32 %s102_s21, 4  ;;  %vm56_vm0 = vcmask 254976   ;;  %s64_s22 = int_to_ptr.vmem [resolvable:$true] %s63_s22 }
   0x9   :  { %v21_v10 = vld [vmem:[%s181_s1 + $0x28] sm:$0xff]  ;;  %v20_v11 = vld [vmem:[%s181_s1 + $0x20] sm:$0xff]  ;;  %v19_v12 = vld [vmem:[%s181_s1 + $0x18] sm:$0xff] }
   0xa   :  { %40 = vmatpush.msra.mxu0 %v27_v4  ;;  %v18_v13 = vld [vmem:[%s181_s1 + $0x10] sm:$0xff]  ;;  %v17_v14 = vld [vmem:[%s181_s1 + $0x8] sm:$0xff]  ;;  %v16_v15 = vld [vmem:[%s181_s1] sm:$0xff] }
   0xb   :  { %v15_v16 = vld [vmem:[%s180_s0] sm:$0x3] }
   0xc   :  { %41 = vmatpush.msra.mxu0 %v26_v5  ;;  %v75_v17 = vld [vmem:[%s182_s2] ss:$0 sm:$0xff] }
   0xe   :  { %42 = vmatpush.msra.mxu0 %v25_v6 }
  0x10   :  { %43 = vmatpush.msra.mxu0 %v24_v7 }
  0x12   :  { %44 = vmatpush.msra.mxu0 %v23_v8 }
  0x14   :  { %45 = vmatpush.msra.mxu0 %v22_v9 }
  0x16   :  { %46 = vmatpush.msra.mxu0 %v21_v10 }
  0x18   :  { %47 = vmatpush.msra.mxu0 %v20_v11 }
  0x1a   :  { %48 = vmatpush.msra.mxu0 %v19_v12 }
  0x1c   :  { %49 = vmatpush.msra.mxu0 %v18_v13 }
  0x1e   :  { %50 = vmatpush.msra.mxu0 %v17_v14 }
  0x20   :  { %51 = vmatpush.msra.mxu0 %v16_v15 }
  0x21   :  { %52 = vmatmul.f32.vlgmr.msra.gmra.mxu0 %v15_v16 }
  0x9e   :  { %v53_v18 = vpop.f32.mrf.mxu0 }
  0x9f   :  { %v54_v19 = vadd.f32 %v75_v17, %v53_v18 }
  0xa1   :  { %57 = vst.msk [vmem:[#allocation2] sm:$0x3] %vm56_vm0, %v54_v19 }
  0xa2   :  { %68 = dma.vmem_to_hbm [thread:$0]  %s64_s22, 32, %s66_s25, [#allocation3]  }
  0xa3   :  { %100 = dma.done.wait [#allocation3], 32  }
  0xa4   :  { %101 = vsyncadd [#allocation3], 4294967264 }
  0xa5   :  { %73 = vsyncpa [#allocation3], 1 }

</bundles_post_ra>
